<compile_context>
chip_gen: v7x
topology: tpu7x:2x2x1
jax: 0.10.0
libtpu: 0.0.40
codegen_flags: <defaults>
</compile_context>

<pallas_src>
import functools
import math

import jax
import jax.numpy as jnp
from jax.experimental import pallas as pl
from jax.experimental.pallas import tpu as pltpu

LANES = 128
MAX_BLOCK_ROWS = 2048  # 2048 x 128 f32 = 1 MiB per input tile.


def _focal_elem(x, t, alpha, gamma):
    """Elementwise focal loss on f32 values (single exp per element)."""
    e = jnp.exp(-jnp.abs(x))  # shared between BCE and sigmoid
    # Stable BCE-with-logits: max(x, 0) - x*t + log1p(exp(-|x|))
    bce = jnp.maximum(x, 0.0) - x * t + jnp.log1p(e)
    # sigmoid(x) = where(x >= 0, 1, e) / (1 + e)   (reuses e)
    sig = jnp.where(x >= 0.0, 1.0, e) / (1.0 + e)
    # NOTE: exact float equality on targets matches the PyTorch reference
    # (torch.where(targets == 1, ...)); soft labels fall into the "negative"
    # branch by design.
    pt = jnp.where(t == 1.0, sig, 1.0 - sig)
    omp = 1.0 - pt
    g = float(gamma)
    if g == int(g) and 0 <= int(g) <= 8:
        gi = int(g)
        if gi == 0:
            w = jnp.ones_like(omp)
        else:
            w = omp
            for _ in range(gi - 1):
                w = w * omp  # VPU multiply chain, no pow on the EUP
    else:
        w = omp ** g
    return (alpha * w) * bce


def _focal_partial_kernel(n_ref, x_ref, t_ref, o_ref, *, alpha, gamma):
    """Per-block, per-lane partial sums (lane-dense (1, 128) output row)."""
    i = pl.program_id(0)
    x = x_ref[...].astype(jnp.float32)
    t = t_ref[...].astype(jnp.float32)
    rows, lanes = x.shape

    # Validity mask for padded / out-of-bounds elements: global flat idx < n.
    row_idx = jax.lax.broadcasted_iota(jnp.int32, (rows, lanes), 0)
    lane_idx = jax.lax.broadcasted_iota(jnp.int32, (rows, lanes), 1)
    flat_idx = (i * rows + row_idx) * lanes + lane_idx
    valid = flat_idx < n_ref[0]

    # Mask *before* the transcendentals so OOB garbage can't produce NaN/inf.
    x = jnp.where(valid, x, 0.0)
    t = jnp.where(valid, t, 0.0)
    loss = jnp.where(valid, _focal_elem(x, t, alpha, gamma), 0.0)

    o_ref[...] = jnp.sum(loss, axis=0, keepdims=True)


def _focal_elementwise_kernel(x_ref, t_ref, o_ref, *, alpha, gamma):
    x = x_ref[...].astype(jnp.float32)
    t = t_ref[...].astype(jnp.float32)
    o_ref[...] = _focal_elem(x, t, alpha, gamma).astype(o_ref.dtype)


def _to_slab(a, n):
    """Flatten to (rows, 128), padding only the ragged tail (< 128 elems)."""
    flat = a.reshape(-1)
    pad = (-n) % LANES
    if pad:
        flat = jnp.pad(flat, (0, pad))
    return flat.reshape((n + pad) // LANES, LANES)


def focal_loss(inputs, targets, alpha=1.0, gamma=2.0, reduction="mean"):
    """Pallas implementation of FocalLoss.forward (binary, with-logits)."""
    orig_shape = inputs.shape
    n = math.prod(orig_shape)

    x2d = _to_slab(inputs, n)   # native dtype; cast happens in-kernel
    t2d = _to_slab(targets, n)
    rows = x2d.shape[0]

    block_rows = rows if rows <= MAX_BLOCK_ROWS else MAX_BLOCK_ROWS
    num_blocks = pl.cdiv(rows, block_rows)
    in_block = (block_rows, LANES)

    if reduction in ("mean", "sum"):
        kernel = functools.partial(
            _focal_partial_kernel, alpha=float(alpha), gamma=float(gamma))
        partials = pl.pallas_call(
            kernel,
            out_shape=jax.ShapeDtypeStruct((num_blocks, LANES), jnp.float32),
            grid_spec=pltpu.PrefetchScalarGridSpec(
                num_scalar_prefetch=1,
                grid=(num_blocks,),
                in_specs=[pl.BlockSpec(in_block, lambda i, n_ref: (i, 0)),
                          pl.BlockSpec(in_block, lambda i, n_ref: (i, 0))],
                out_specs=pl.BlockSpec((1, LANES), lambda i, n_ref: (i, 0)),
            ),
            compiler_params=pltpu.CompilerParams(
                dimension_semantics=("parallel",)),
        )(jnp.asarray([n], dtype=jnp.int32), x2d, t2d)
        total = jnp.sum(partials)  # tiny (num_blocks x 128) reduce in XLA
        return total / n if reduction == "mean" else total

    # reduction == 'none': elementwise loss, same shape as inputs.
    out_dtype = (inputs.dtype if jnp.issubdtype(inputs.dtype, jnp.floating)
                 else jnp.float32)
    kernel = functools.partial(
        _focal_elementwise_kernel, alpha=float(alpha), gamma=float(gamma))
    out2d = pl.pallas_call(
        kernel,
        out_shape=jax.ShapeDtypeStruct((rows, LANES), out_dtype),
        grid=(num_blocks,),
        in_specs=[pl.BlockSpec(in_block, lambda i: (i, 0)),
                  pl.BlockSpec(in_block, lambda i: (i, 0))],
        out_specs=pl.BlockSpec(in_block, lambda i: (i, 0)),
        compiler_params=pltpu.CompilerParams(
            dimension_semantics=("parallel",)),
    )(x2d, t2d)
    return out2d.reshape(-1)[:n].reshape(orig_shape)


def _focal_loss_ref(inputs, targets, alpha=1.0, gamma=2.0, reduction="mean"):
    """Pure-JAX reference mirroring the PyTorch module."""
    x = inputs.astype(jnp.float32)
    t = targets.astype(jnp.float32)
    bce = jnp.maximum(x, 0.0) - x * t + jnp.log1p(jnp.exp(-jnp.abs(x)))
    p = jax.nn.sigmoid(x)
    pt = jnp.where(t == 1.0, p, 1.0 - p)
    loss = alpha * (1.0 - pt) ** gamma * bce
    if reduction == "mean":
        return loss.mean()
    if reduction == "sum":
        return loss.sum()
    return loss


if __name__ == "__main__":
    key = jax.random.PRNGKey(0)
    k1, k2, k3, k4 = jax.random.split(key, 4)

    # Segmentation-style logits, NCHW.
    x = jax.random.normal(k1, (2, 4, 16, 16), dtype=jnp.float32) * 2.0
    tgt = jax.random.bernoulli(k2, p=0.3, shape=(2, 4, 16, 16)).astype(jnp.float32)

    out = jax.block_until_ready(focal_loss(x, tgt, 1.0, 2.0, "mean"))
    ref = _focal_loss_ref(x, tgt, 1.0, 2.0, "mean")
    assert jnp.allclose(out, ref, atol=1e-5, rtol=1e-5), (out, ref)

    out_sum = jax.block_until_ready(focal_loss(x, tgt, 0.5, 2.0, "sum"))
    ref_sum = _focal_loss_ref(x, tgt, 0.5, 2.0, "sum")
    assert jnp.allclose(out_sum, ref_sum, atol=1e-4, rtol=1e-4), (out_sum, ref_sum)

    out_none = jax.block_until_ready(focal_loss(x, tgt, reduction="none"))
    ref_none = _focal_loss_ref(x, tgt, reduction="none")
    assert out_none.shape == x.shape
    assert jnp.allclose(out_none, ref_none, atol=1e-5, rtol=1e-5)

    # Ragged size exercises the in-kernel mask for the padded / OOB tail.
    xr = jax.random.normal(k3, (3, 5, 7), dtype=jnp.float32)
    tr = jax.random.bernoulli(k4, p=0.5, shape=(3, 5, 7)).astype(jnp.float32)
    out_r = jax.block_until_ready(focal_loss(xr, tr, 1.0, 2.0, "mean"))
    ref_r = _focal_loss_ref(xr, tr, 1.0, 2.0, "mean")
    assert jnp.allclose(out_r, ref_r, atol=1e-5, rtol=1e-5), (out_r, ref_r)

    print("KERNEL_OK")
</pallas_src>

<mosaic_0001>
module attributes {stable_mosaic.version = 11 : i64} {
  func.func @_focal_partial_kernel(%arg0: i32, %arg1: memref<1xi32, #tpu.memory_space<smem>>, %arg2: memref<16x128xf32, #tpu.memory_space<vmem>>, %arg3: memref<16x128xf32, #tpu.memory_space<vmem>>, %arg4: memref<1x128xf32, #tpu.memory_space<vmem>>) attributes {dimension_semantics = [#tpu.dimension_semantics<parallel>], iteration_bounds = array<i64: 1>, scalar_prefetch = 1 : i64, scratch_operands = 0 : i64, tpu.core_type = #tpu.core_type<tc>, window_params = [{transform_indices = @transform_0, window_bounds = array<i64: 16, 128>}, {transform_indices = @transform_1, window_bounds = array<i64: 16, 128>}, {transform_indices = @transform_2, window_bounds = array<i64: 1, 128>}]} {
    %c0 = arith.constant 0 : index
    %c0_0 = arith.constant 0 : index
    %0 = vector.load %arg2[%c0, %c0_0] : memref<16x128xf32, #tpu.memory_space<vmem>>, vector<16x128xf32>
    %c0_1 = arith.constant 0 : index
    %c0_2 = arith.constant 0 : index
    %1 = vector.load %arg3[%c0_1, %c0_2] : memref<16x128xf32, #tpu.memory_space<vmem>>, vector<16x128xf32>
    %2 = tpu.iota {dimensions = array<i32: 0>} : vector<16x128xi32>
    %3 = tpu.iota {dimensions = array<i32: 1>} : vector<16x128xi32>
    %c16_i32 = arith.constant 16 : i32
    %4 = arith.muli %arg0, %c16_i32 : i32
    %5 = vector.broadcast %4 : i32 to vector<16x128xi32>
    %6 = arith.addi %5, %2 : vector<16x128xi32>
    %c128_i32 = arith.constant 128 : i32
    %7 = vector.broadcast %c128_i32 : i32 to vector<16x128xi32>
    %8 = arith.muli %6, %7 : vector<16x128xi32>
    %9 = arith.addi %8, %3 : vector<16x128xi32>
    %c0_3 = arith.constant 0 : index
    %10 = memref.load %arg1[%c0_3] : memref<1xi32, #tpu.memory_space<smem>>
    %11 = vector.broadcast %10 : i32 to vector<16x128xi32>
    %12 = arith.cmpi slt, %9, %11 : vector<16x128xi32>
    %cst = arith.constant 0.000000e+00 : f32
    %13 = vector.broadcast %cst : f32 to vector<16x128xf32>
    %14 = arith.select %12, %0, %13 : vector<16x128xi1>, vector<16x128xf32>
    %cst_4 = arith.constant 0.000000e+00 : f32
    %15 = vector.broadcast %cst_4 : f32 to vector<16x128xf32>
    %16 = arith.select %12, %1, %15 : vector<16x128xi1>, vector<16x128xf32>
    %17 = math.absf %14 : vector<16x128xf32>
    %cst_5 = arith.constant 0.000000e+00 : f32
    %18 = vector.broadcast %cst_5 : f32 to vector<16x128xf32>
    %19 = arith.subf %18, %17 : vector<16x128xf32>
    %20 = math.exp %19 : vector<16x128xf32>
    %cst_6 = arith.constant 0.000000e+00 : f32
    %21 = vector.broadcast %cst_6 : f32 to vector<16x128xf32>
    %22 = arith.maximumf %14, %21 : vector<16x128xf32>
    %23 = arith.mulf %14, %16 : vector<16x128xf32>
    %24 = arith.subf %22, %23 : vector<16x128xf32>
    %25 = math.log1p %20 : vector<16x128xf32>
    %26 = arith.addf %24, %25 : vector<16x128xf32>
    %cst_7 = arith.constant 0.000000e+00 : f32
    %27 = vector.broadcast %cst_7 : f32 to vector<16x128xf32>
    %28 = arith.cmpf oge, %14, %27 : vector<16x128xf32>
    %cst_8 = arith.constant 1.000000e+00 : f32
    %29 = vector.broadcast %cst_8 : f32 to vector<16x128xf32>
    %30 = arith.select %28, %29, %20 : vector<16x128xi1>, vector<16x128xf32>
    %cst_9 = arith.constant 1.000000e+00 : f32
    %31 = vector.broadcast %cst_9 : f32 to vector<16x128xf32>
    %32 = arith.addf %31, %20 : vector<16x128xf32>
    %33 = arith.divf %30, %32 : vector<16x128xf32>
    %cst_10 = arith.constant 1.000000e+00 : f32
    %34 = vector.broadcast %cst_10 : f32 to vector<16x128xf32>
    %35 = arith.cmpf oeq, %16, %34 : vector<16x128xf32>
    %cst_11 = arith.constant 1.000000e+00 : f32
    %36 = vector.broadcast %cst_11 : f32 to vector<16x128xf32>
    %37 = arith.subf %36, %33 : vector<16x128xf32>
    %38 = arith.select %35, %33, %37 : vector<16x128xi1>, vector<16x128xf32>
    %cst_12 = arith.constant 1.000000e+00 : f32
    %39 = vector.broadcast %cst_12 : f32 to vector<16x128xf32>
    %40 = arith.subf %39, %38 : vector<16x128xf32>
    %41 = arith.mulf %40, %40 : vector<16x128xf32>
    %cst_13 = arith.constant 1.000000e+00 : f32
    %42 = vector.broadcast %cst_13 : f32 to vector<16x128xf32>
    %43 = arith.mulf %42, %41 : vector<16x128xf32>
    %44 = arith.mulf %43, %26 : vector<16x128xf32>
    %cst_14 = arith.constant 0.000000e+00 : f32
    %45 = vector.broadcast %cst_14 : f32 to vector<16x128xf32>
    %46 = arith.select %12, %44, %45 : vector<16x128xi1>, vector<16x128xf32>
    %cst_15 = arith.constant dense<0.000000e+00> : vector<128xf32>
    %47 = vector.multi_reduction <add>, %46, %cst_15 [0] : vector<16x128xf32> to vector<128xf32>
    %48 = vector.shape_cast %47 : vector<128xf32> to vector<1x128xf32>
    %c0_16 = arith.constant 0 : index
    %c0_17 = arith.constant 0 : index
    %49 = vector.load %arg4[%c0_16, %c0_17] : memref<1x128xf32, #tpu.memory_space<vmem>>, vector<1x128xf32>
    tpu.vector_store %arg4[%c0_16, %c0_17], %48 {strides = array<i32>} : memref<1x128xf32, #tpu.memory_space<vmem>>, vector<1x128xf32>,
    return
  }
  func.func @transform_0(%arg0: i32, %arg1: memref<1xi32, #tpu.memory_space<smem>>) -> (i32, i32) {
    %c0_i32 = arith.constant 0 : i32
    %c0_i32_0 = arith.constant 0 : i32
    return %arg0, %c0_i32 : i32, i32
  }
  func.func @transform_1(%arg0: i32, %arg1: memref<1xi32, #tpu.memory_space<smem>>) -> (i32, i32) {
    %c0_i32 = arith.constant 0 : i32
    %c0_i32_0 = arith.constant 0 : i32
    return %arg0, %c0_i32 : i32, i32
  }
  func.func @transform_2(%arg0: i32, %arg1: memref<1xi32, #tpu.memory_space<smem>>) -> (i32, i32) {
    %c0_i32 = arith.constant 0 : i32
    %c0_i32_0 = arith.constant 0 : i32
    return %arg0, %c0_i32 : i32, i32
  }
}

</mosaic_0001>

<bundles_post_ra>
// kernel: tpu_custom_call.1
= control target key start
LH: loop header
LB: loop body
LE: loop exit
PB: predicated region body
PF: predicated region fallthrough
CT: control target
= control target key end

     0   :  { %9 = vsyncpa [#allocation5], 0  ;;  %s328_s0 = inlined_call_operand.<no memory space> [shape: s32[1], index: 0, kind: input, shape index: {}]   ;;  %s329_s1 = inlined_call_operand.hbm [shape: f32[16,128], index: 1, kind: input, shape index: {}]   ;;  %s330_s2 = inlined_call_operand.hbm [shape: f32[16,128], index: 2, kind: input, shape index: {}]   ;;  %s331_s3 = inlined_call_operand.hbm [shape: f32[1,128], index: 3, kind: output, shape index: {}]  }
   0x1   :  { %10 = vsyncpa [#allocation8], 0 }
   0x2   :  { %11 = vsyncpa [#allocation6], 0  ;;  %s238_s12 = smov [#allocation4]   ;;  %s166_s16 = scalar_lea.hbm %s329_s1, 256 }
   0x3   :  { %s17_s13 = sshll.u32 %s238_s12, 4  ;;  %p167_p0 = scmp.ne.s32.totalorder %s329_s1, %s166_s16  ;;  %s18_s13 = int_to_ptr.vmem [resolvable:$true] %s17_s13 }
   0x4   :  { %p170_p1 = scmp.lt.u32.totalorder %s166_s16, %s329_s1 }
   0x6   :  { %p172_p2 = pnand %p170_p1, %p167_p0 }
   0x8   :  { %175 = shalt.err (!%p172_p2)
}
   0x9   :  { %s176_s21 = scalar_lea.vmem %s18_s13, 256  ;;  %p181_p4 = scmp.lt.s32.totalorder %s18_s13, %s18_s13 }
   0xa   :  { %p177_p3 = scmp.ne.s32.totalorder %s18_s13, %s176_s21  ;;  %p182_p5 = scmp.lt.s32.totalorder %s176_s21, %s176_s21 }
   0xc   :  { %p183_p6 = por %p182_p5, %p181_p4 }
   0xe   :  { %p184_p7 = pnand %p183_p6, %p177_p3 }
  0x10   :  { %187 = shalt.err (!%p184_p7)
}
  0x11   :  { %s239_s22 = smov 128   ;;  %s240_s23 = smov 8  }
  0x12   :  { %23 = dma.hbm_to_vmem [thread:$0]  %s329_s1, 256, %s18_s13, [#allocation5], %s239_s22, %s239_s22, %s240_s23  }
  0x13   :  { %s241_s26 = smov [#allocation7]   ;;  %s188_s30 = scalar_lea.hbm %s330_s2, 256 }
  0x14   :  { %s29_s27 = sshll.u32 %s241_s26, 4  ;;  %p189_p8 = scmp.ne.s32.totalorder %s330_s2, %s188_s30  ;;  %s30_s27 = int_to_ptr.vmem [resolvable:$true] %s29_s27 }
  0x15   :  { %p192_p9 = scmp.lt.u32.totalorder %s188_s30, %s330_s2 }
  0x17   :  { %p194_p10 = pnand %p192_p9, %p189_p8 }
  0x19   :  { %197 = shalt.err (!%p194_p10)
}
  0x1a   :  { %s198_s8 = scalar_lea.vmem %s30_s27, 256  ;;  %p203_p12 = scmp.lt.s32.totalorder %s30_s27, %s30_s27 }
  0x1b   :  { %p199_p11 = scmp.ne.s32.totalorder %s30_s27, %s198_s8  ;;  %p204_p13 = scmp.lt.s32.totalorder %s198_s8, %s198_s8 }
  0x1d   :  { %p205_p0 = por %p204_p13, %p203_p12 }
  0x1f   :  { %p206_p1 = pnand %p205_p0, %p199_p11 }
  0x21   :  { %209 = shalt.err (!%p206_p1)
}
  0x22   :  { %35 = dma.hbm_to_vmem [thread:$0]  %s330_s2, 256, %s30_s27, [#allocation8], %s239_s22, %s239_s22, %s240_s23  }
  0x23   :  { %232 = dma.done.wait [#allocation5], 256  }
  0x24   :  { %233 = vsyncadd [#allocation5], 4294967040 }
  0x25   :  { %234 = dma.done.wait [#allocation8], 256  }
  0x26   :  { %235 = vsyncadd [#allocation8], 4294967040  ;;  %v46_v0 = vlaneseq  ;;  %v60_v5 = vstv %s328_s0  ;;  %v42_v8 = vld [vmem:[#allocation4] sm:$0xff]  ;;  %v43_v9 = vld [vmem:[#allocation4 + $0x8] sm:$0xff]  ;;  %s242_s0 = smov [#allocation9]  }
  0x27   :  { %v44_v26 = vld [vmem:[#allocation7] sm:$0xff]  ;;  %v45_v28 = vld [vmem:[#allocation7 + $0x8] sm:$0xff]  ;;  %s139_s2 = sshll.u32 %s242_s0, 4  ;;  %s140_s2 = int_to_ptr.vmem [resolvable:$true] %s139_s2 }
  0x28   :  { %v47_v1 = vshrl.u32 %v46_v0, 7  ;;  %v50_v2 = vand.u32 127, %v46_v0  ;;  %s210_s12 = scalar_lea.vmem %s140_s2, 16  ;;  %s214_s13 = scalar_lea.vmem %s140_s2, 32 }
  0x29   :  { %p211_p2 = scmp.ne.s32.totalorder %s140_s2, %s210_s12  ;;  %p215_p3 = scmp.lt.s32.totalorder %s140_s2, %s140_s2 }
  0x2a   :  { %v48_v3 = vadd.s32 8, %v47_v1  ;;  %v55_v4 = vmul.u32 128, %v47_v1  ;;  %p216_p4 = scmp.lt.s32.totalorder %s214_s13, %s210_s12 }
  0x2c   :  { %v56_v6 = vmul.u32 128, %v48_v3  ;;  %v57_v7 = vadd.s32 %v55_v4, %v50_v2  ;;  %p217_p5 = por %p216_p4, %p215_p3 }
  0x2e   :  { %v58_v10 = vadd.s32 %v56_v6, %v50_v2  ;;  %vm290_vm0 = vcmp.lt.s32.totalorder %v57_v7, %v60_v5  ;;  %p218_p6 = pnand %p217_p5, %p211_p2 }
  0x2f   :  { %v63_v12 = vsel %vm290_vm0, %v42_v8, 0.0  ;;  %v65_v29 = vsel %vm290_vm0, %v44_v26, 0.0 }
  0x30   :  { %vm296_vm1 = vcmp.lt.s32.totalorder %v58_v10, %v60_v5  ;;  %v67_v14 = vand.u32 2147483647, %v63_v12  ;;  %vm101_vm2 = vcmp.ge.f32.partialorder %v63_v12, 0.0  ;;  %v75_v34 = vmax.f32 %v63_v12, 0.0 }
  0x31   :  { %v64_v15 = vsel %vm296_vm1, %v43_v9, 0.0  ;;  %v66_v32 = vsel %vm296_vm1, %v45_v28, 0.0  ;;  %v77_v35 = vmul.f32 %v65_v29, %v63_v12  ;;  %vm111_vm6 = vcmp.eq.f32.partialorder %v65_v29, 1.0 }
  0x32   :  { %v68_v16 = vand.u32 2147483647, %v64_v15  ;;  %v69_v17 = vsub.f32 0.0, %v67_v14  ;;  %vm102_vm3 = vcmp.ge.f32.partialorder %v64_v15, 0.0  ;;  %v76_v39 = vmax.f32 %v64_v15, 0.0 }
  0x33   :  { %v78_v42 = vmul.f32 %v66_v32, %v64_v15  ;;  %v79_v50 = vsub.f32 %v75_v34, %v77_v35  ;;  %vm112_vm7 = vcmp.eq.f32.partialorder %v66_v32, 1.0 }
  0x34   :  { %v70_v18 = vsub.f32 0.0, %v68_v16  ;;  %v71_v19 = vmul.f32 1.442695, %v69_v17 }
  0x35   :  { %v80_v55 = vsub.f32 %v76_v39, %v78_v42 }
  0x36   :  { %154 = vpow2.f32 %v71_v19  ;;  %v73_v20 = vmul.f32 1.442695, %v70_v18 }
  0x38   :  { %156 = vpow2.f32 %v73_v20 }
  0x40   :  { %v155_v21 = vpop.eup %154 }
  0x41   :  { %v81_v22 = vadd.f32 1.0, %v155_v21  ;;  %v84_v25 = vmul.f32 -0.5, %v155_v21  ;;  %v87_v31 = vand.u32 2147483647, %v155_v21  ;;  %v103_v37 = vsel %vm101_vm2, 1.0, %v155_v21 }
  0x42   :  { %v157_v23 = vpop.eup %156 }
  0x43   :  { %158 = vlog2.f32 %v81_v22  ;;  %v90_v24 = vadd.f32 1.0, %v157_v23  ;;  %v93_v27 = vmul.f32 -0.5, %v157_v23  ;;  %v85_v30 = vadd.f32 1.0, %v84_v25 }
  0x44   :  { %160 = vrcp.f32 %v81_v22  ;;  %v96_v36 = vand.u32 2147483647, %v157_v23  ;;  %vm306_vm4 = vcmp.lt.f32.partialorder %v87_v31, 0.0004427343  ;;  %v104_v45 = vsel %vm102_vm3, 1.0, %v157_v23 }
  0x45   :  { %162 = vlog2.f32 %v90_v24  ;;  %v94_v33 = vadd.f32 1.0, %v93_v27  ;;  %v86_v40 = vmul.f32 %v155_v21, %v85_v30 }
  0x46   :  { %164 = vrcp.f32 %v90_v24  ;;  %vm97_vm5 = vcmp.lt.f32.partialorder %v96_v36, 0.0004427343 }
  0x47   :  { %v95_v47 = vmul.f32 %v157_v23, %v94_v33 }
  0x4d   :  { %v159_v38 = vpop.eup %158 }
  0x4e   :  { %v161_v41 = vpop.eup %160  ;;  %v83_v43 = vmul.f32 0.6931472, %v159_v38 }
  0x4f   :  { %v163_v46 = vpop.eup %162  ;;  %v108_v48 = vmul.f32 %v161_v41, %v103_v37 }
  0x50   :  { %v165_v49 = vpop.eup %164  ;;  %v92_v51 = vmul.f32 0.6931472, %v163_v46  ;;  %v89_v52 = vsel %vm306_vm4, %v86_v40, %v83_v43 }
  0x51   :  { %v110_v53 = vmul.f32 %v165_v49, %v104_v45  ;;  %v113_v54 = vsub.f32 1.0, %v108_v48  ;;  %v99_v59 = vadd.f32 %v89_v52, %v79_v50 }
  0x52   :  { %v98_v56 = vsel %vm97_vm5, %v95_v47, %v92_v51 }
  0x53   :  { %v114_v57 = vsub.f32 1.0, %v110_v53  ;;  %v115_v58 = vsel %vm111_vm6, %v108_v48, %v113_v54  ;;  %v100_v62 = vadd.f32 %v98_v56, %v80_v55 }
  0x54   :  { %v117_v60 = vsub.f32 1.0, %v115_v58 }
  0x55   :  { %v116_v61 = vsel %vm112_vm7, %v110_v53, %v114_v57 }
  0x56   :  { %v118_v63 = vsub.f32 1.0, %v116_v61  ;;  %v119_v0 = vmul.f32 %v117_v60, %v117_v60 }
  0x58   :  { %v120_v1 = vmul.f32 %v118_v63, %v118_v63  ;;  %v121_v2 = vmul.f32 %v119_v0, %v99_v59 }
  0x5a   :  { %v122_v3 = vmul.f32 %v120_v1, %v100_v62  ;;  %v123_v4 = vsel %vm290_vm0, %v121_v2, 0.0 }
  0x5c   :  { %v124_v5 = vsel %vm296_vm1, %v122_v3, 0.0 }
  0x5d   :  { %v125_v6 = vadd.f32 %v124_v5, %v123_v4 }
  0x5f   :  { %v126_v7 = vrot.slane %v125_v6, 4 }
  0x61   :  { %v127_v8 = vadd.f32 %v126_v7, %v125_v6 }
  0x63   :  { %v128_v9 = vrot.slane %v127_v8, 2 }
  0x65   :  { %v129_v10 = vadd.f32 %v128_v9, %v127_v8 }
  0x67   :  { %v130_v12 = vrot.slane %v129_v10, 1 }
  0x69   :  { %v131_v14 = vadd.f32 %v130_v12, %v129_v10 }
  0x6b   :  { %132 = vst [vmem:[#allocation9] sm:$0x1] %v131_v14 }
  0x6c   :  { %221 = shalt.err (!%p218_p6)
}
  0x6d   :  { %s222_s16 = scalar_lea.hbm %s331_s3, 16 }
  0x6e   :  { %p223_p7 = scmp.ne.s32.totalorder %s331_s3, %s222_s16  ;;  %p226_p8 = scmp.lt.u32.totalorder %s222_s16, %s331_s3 }
  0x70   :  { %p228_p9 = pnand %p226_p8, %p223_p7 }
  0x72   :  { %231 = shalt.err (!%p228_p9)
}
  0x73   :  { %142 = dma.vmem_to_hbm [thread:$0]  %s140_s2, 16, %s331_s3, [#allocation6]  }
  0x74   :  { %236 = dma.done.wait [#allocation6], 16  }
  0x75   :  { %237 = vsyncadd [#allocation6], 4294967280 }
  0x76   :  { %146 = vsyncpa [#allocation5], 1 }
  0x77   :  { %147 = vsyncpa [#allocation8], 1 }
  0x78   :  { %148 = vsyncpa [#allocation6], 1 }

</bundles_post_ra>
